<compile_context>
chip_gen: v6e
topology: v6e:2x2x1
jax: 0.10.0
libtpu: 0.0.40
codegen_flags: <defaults>
</compile_context>

<pallas_src>
import functools
import math

import jax
import jax.numpy as jnp
from jax.experimental import pallas as pl
from jax.experimental.pallas import tpu as pltpu


# ---------------------------------------------------------------------------
# small helpers
# ---------------------------------------------------------------------------
_LANE = 128     # lane width  (last dim alignment)
_SUBLANE = 8    # sublane     (second-to-last dim alignment)


def _round_up(x, m):
    return (x + m - 1) // m * m


def _cdiv(a, b):
    return -(-a // b)


def _pad2d(a, rows, cols):
    r, c = a.shape
    if r == rows and c == cols:
        return a
    return jnp.pad(a, ((0, rows - r), (0, cols - c)))


# ---------------------------------------------------------------------------
# generation awareness (v5e/v6e: 128 MiB VMEM, v7x: 64 MiB per TensorCore)
# ---------------------------------------------------------------------------
def _vmem_capacity_bytes():
    try:
        return int(pltpu.get_tpu_info().vmem_capacity_bytes)
    except Exception:
        return 64 << 20          # conservative default (v7x per-TC VMEM)


_VMEM_CAP = _vmem_capacity_bytes()
_SMALL_VMEM = _VMEM_CAP <= (80 << 20)        # v7x-class part
# Never hand the kernel the entire physical VMEM: leave headroom for Mosaic
# internal scratch.  v7x: ~56 MiB; v5e/v6e: ~110 MiB.
_VMEM_CEILING = (int(_VMEM_CAP * 7 // 8) if _SMALL_VMEM
                 else min(int(_VMEM_CAP * 0.86), 110 << 20))
# Resident fused weights (single-buffered) may occupy ~35% of VMEM.
_FUSABLE_WEIGHT_BUDGET = int(_VMEM_CAP * 0.35)
# Streaming-M tile preference: bigger DMAs on the 128 MiB / lower-BW parts.
_M_TILE_PREF = 256 if _SMALL_VMEM else 512
_MATMUL_TILE_PREF = 512          # fallback tm/tn/tk preference


def _clamp_vmem_limit(est_bytes):
    return int(min(max(int(est_bytes * 1.25) + (2 << 20), 32 << 20),
                   _VMEM_CEILING))


def _choose_tile(dim, pref, align):
    """Tile size <= pref dividing a minimally padded dim (no ~2x inflation)."""
    d = _round_up(dim, align)
    if d <= pref:
        return d, d
    n = _cdiv(d, pref)
    t = _round_up(_cdiv(d, n), align)
    padded = t * n
    assert padded - d < t + align, "over-padding guard"
    return t, padded


def _choose_m_tile(m_rows, pref):
    """Streaming-M tile: aim for >=2 grid steps (keeps v7x's 2nd TC busy)."""
    mp0 = _round_up(m_rows, _SUBLANE)
    if mp0 <= _SUBLANE:
        return mp0, mp0
    n = max(2, _cdiv(mp0, pref))
    t = _round_up(_cdiv(mp0, n), _SUBLANE)
    return t, t * n


# ---------------------------------------------------------------------------
# Kernel 1: fused chain  y = actL(...act1(act0(x@W0^T+b0)@W1^T+b1)...)
#   - weights (L, Hp, Hp) + biases (L, 1, Hp) resident in VMEM (Buffered(1))
#   - activation tile stays in VMEM/vregs across all layers
# ---------------------------------------------------------------------------
def _fused_chain_kernel(x_ref, wt_ref, b_ref, o_ref, *, gelu_flags, out_lanes):
    # x_ref : (tm, Hp)     activation tile (native dtype; cast to bf16 here)
    # wt_ref: (L, Hp, Hp)  bf16 pre-transposed weights (wt[l] = W_l^T)
    # b_ref : (L, 1, Hp)   f32 biases
    # o_ref : (tm, out_lanes) f32 output tile (narrowed to valid lanes)
    num_layers = len(gelu_flags)
    h = x_ref[...].astype(jnp.bfloat16)
    acc = None
    for l in range(num_layers):
        acc = jnp.dot(h, wt_ref[l], preferred_element_type=jnp.float32)
        acc = acc + b_ref[l]
        if gelu_flags[l]:
            # TODO(synk): torch.nn.GELU defaults to exact erf; switch to
            # jax.nn.gelu(..., approximate=False) for strict PyTorch parity
            # (tanh form kept: EUP-friendly, less VALU pressure on v5e).
            acc = jax.nn.gelu(acc)
        if l + 1 < num_layers:
            h = acc.astype(jnp.bfloat16)      # bf16 for the next MXU pass
    o_ref[...] = acc[:, :out_lanes].astype(o_ref.dtype)


def fused_chain_forward(x2d, wts_stacked, bs_stacked, gelu_flags, n_valid_out):
    """x2d: (M, H).  wts_stacked: (L, Hp, Hp) bf16 pre-transposed/padded.
    bs_stacked: (L, 1, Hp) f32.  Returns (M, n_valid_out) f32."""
    M, H = x2d.shape
    L, Hp, _ = wts_stacked.shape
    out_lanes = min(_round_up(n_valid_out, _LANE), Hp)

    tm, Mp = _choose_m_tile(M, _M_TILE_PREF)
    # Skip the separate pad/cast pre-pass when already aligned; the bf16 cast
    # happens in-kernel so activations are read from HBM exactly once.
    xp = x2d if (Mp == M and Hp == H) else _pad2d(x2d, Mp, Hp)

    kernel = functools.partial(_fused_chain_kernel,
                               gelu_flags=tuple(gelu_flags),
                               out_lanes=out_lanes)

    x_itemsize = jnp.dtype(xp.dtype).itemsize
    vmem_est = (wts_stacked.size * 2            # resident weights (1 buffer)
                + bs_stacked.size * 4           # resident bias    (1 buffer)
                + 2 * tm * Hp * x_itemsize      # streaming input tiles (x2)
                + 2 * tm * out_lanes * 4        # streaming output tiles (x2)
                + 3 * tm * Hp * 4)              # in-kernel f32 acc / h / gelu temps

    out = pl.pallas_call(
        kernel,
        out_shape=jax.ShapeDtypeStruct((Mp, out_lanes), jnp.float32),
        grid=(Mp // tm,),
        in_specs=[
            pl.BlockSpec((tm, Hp), lambda i: (i, 0)),          # streaming x
            pl.BlockSpec((L, Hp, Hp), lambda i: (0, 0, 0),
                         pipeline_mode=pl.Buffered(1)),        # resident W^T
            pl.BlockSpec((L, 1, Hp), lambda i: (0, 0, 0),
                         pipeline_mode=pl.Buffered(1)),        # resident bias
        ],
        out_specs=pl.BlockSpec((tm, out_lanes), lambda i: (i, 0)),
        compiler_params=pltpu.CompilerParams(
            dimension_semantics=("parallel",),
            vmem_limit_bytes=_clamp_vmem_limit(vmem_est),
        ),
    )(xp, wts_stacked, bs_stacked)
    return out[:M, :n_valid_out]


# ---------------------------------------------------------------------------
# Kernel 2 (fallback): single tiled linear  y = act(x @ W^T + b)
#   (M//tm, N//tn, K//tk) grid, f32 VMEM accumulator, pl.when init/epilogue
# ---------------------------------------------------------------------------
def _linear_tiled_kernel(x_ref, wt_ref, b_ref, o_ref, acc_ref, *, use_gelu):
    k = pl.program_id(2)

    @pl.when(k == 0)
    def _():
        acc_ref[...] = jnp.zeros_like(acc_ref)

    acc_ref[...] += jnp.dot(x_ref[...].astype(jnp.bfloat16), wt_ref[...],
                            preferred_element_type=jnp.float32)

    @pl.when(k == pl.num_programs(2) - 1)
    def _():
        acc = acc_ref[...] + b_ref[...]
        if use_gelu:
            acc = jax.nn.gelu(acc)
        o_ref[...] = acc.astype(o_ref.dtype)


def pallas_linear_tiled(x2d, wt_bf16, bias_f32, *, n_valid, use_gelu,
                        out_dtype=jnp.float32):
    """x2d: (M, K); wt_bf16: (Kp0, Np0) pre-transposed/padded bf16 weight;
    bias_f32: (1, Np0) f32.  Returns (M, n_valid) in out_dtype."""
    M, K = x2d.shape
    Kp0, Np0 = wt_bf16.shape

    tm, Mp = _choose_m_tile(M, _MATMUL_TILE_PREF)
    tn, Np = _choose_tile(Np0, _MATMUL_TILE_PREF, _LANE)
    tk, Kp = _choose_tile(Kp0, _MATMUL_TILE_PREF, _LANE)

    xp = x2d if (Mp == M and Kp == K) else _pad2d(x2d, Mp, Kp)
    wtp = wt_bf16 if (Kp == Kp0 and Np == Np0) else _pad2d(wt_bf16, Kp, Np)
    bp = bias_f32 if Np == Np0 else _pad2d(bias_f32, 1, Np)

    kernel = functools.partial(_linear_tiled_kernel, use_gelu=use_gelu)

    in_bytes = jnp.dtype(xp.dtype).itemsize
    out_bytes = jnp.dtype(out_dtype).itemsize
    vmem_est = (2 * tm * tk * in_bytes        # double-buffered LHS tiles
                + 2 * tk * tn * 2             # double-buffered bf16 RHS tiles
                + 2 * tn * 4                  # bias slices
                + 2 * tm * tn * out_bytes     # double-buffered output tiles
                + tm * tn * 4                 # f32 accumulator scratch
                + 2 * tm * tn * 4)            # epilogue (bias/gelu) f32 temps

    out = pl.pallas_call(
        kernel,
        out_shape=jax.ShapeDtypeStruct((Mp, Np), out_dtype),
        grid=(Mp // tm, Np // tn, Kp // tk),
        in_specs=[
            pl.BlockSpec((tm, tk), lambda i, j, k: (i, k)),
            pl.BlockSpec((tk, tn), lambda i, j, k: (k, j)),
            pl.BlockSpec((1, tn), lambda i, j, k: (0, j)),
        ],
        out_specs=pl.BlockSpec((tm, tn), lambda i, j, k: (i, j)),
        scratch_shapes=[pltpu.VMEM((tm, tn), jnp.float32)],
        compiler_params=pltpu.CompilerParams(
            dimension_semantics=("parallel", "parallel", "arbitrary"),
            vmem_limit_bytes=_clamp_vmem_limit(vmem_est),
        ),
    )(xp, wtp, bp)
    return out[:M, :n_valid]


# ---------------------------------------------------------------------------
# Sub-module: full-precision Linear(+GELU) with the quant-aware call signature
# ---------------------------------------------------------------------------
class QuantLinearFP:
    """Full-precision linear layer; (epoch, iteration, device_id) are accepted
    for API parity with the quantized variants but unused here."""

    def __init__(self, key, in_features, out_features, use_gelu):
        kw, kb = jax.random.split(key)
        bound = 1.0 / math.sqrt(in_features)
        self.weight = jax.random.uniform(
            kw, (out_features, in_features), jnp.float32, -bound, bound)
        self.bias = jax.random.uniform(
            kb, (out_features,), jnp.float32, -bound, bound)
        self.use_gelu = use_gelu
        self.in_features = in_features
        self.out_features = out_features

        # Prepared ONCE (no per-call transpose / reshape): transposed,
        # zero-padded to lane-aligned shapes, bf16 for the MXU.
        self.k_pad = _round_up(in_features, _LANE)
        self.n_pad = _round_up(out_features, _LANE)
        self.wt_bf16 = _pad2d(self.weight.T, self.k_pad, self.n_pad).astype(
            jnp.bfloat16)                                            # (Kp, Np)
        self.bias_f32 = _pad2d(self.bias.reshape(1, -1), 1, self.n_pad)  # (1, Np)

    def __call__(self, x, epoch, iteration, device_id, *, out_dtype=jnp.float32):
        # epoch/iteration/device_id drive quantization scheduling in the
        # original repo; the full-precision module ignores them.
        B, S, H = x.shape
        y2d = pallas_linear_tiled(x.reshape(B * S, H), self.wt_bf16,
                                  self.bias_f32, n_valid=self.out_features,
                                  use_gelu=self.use_gelu, out_dtype=out_dtype)
        return y2d.reshape(B, S, self.out_features)


# ---------------------------------------------------------------------------
# CustomSequential: exact forward semantics of the PyTorch module
# (fused into a single Pallas kernel when the chain allows it)
# ---------------------------------------------------------------------------
class CustomSequential:
    def __init__(self, *modules, fuse=True):
        self.modules_list = list(modules)
        self._fusable = fuse and self._check_fusable()
        if self._fusable:
            self._wts = jnp.stack([m.wt_bf16 for m in self.modules_list])   # (L,Hp,Hp)
            self._bs = jnp.stack([m.bias_f32 for m in self.modules_list])   # (L,1,Hp)
            self._gelu_flags = tuple(m.use_gelu for m in self.modules_list)
            self._out_features = self.modules_list[-1].out_features
        self._jit_forward = jax.jit(self._forward_impl)

    def _check_fusable(self):
        mods = self.modules_list
        if not mods or not all(isinstance(m, QuantLinearFP) for m in mods):
            return False
        for a, b in zip(mods[:-1], mods[1:]):
            if a.out_features != b.in_features:
                return False
        dims = {m.k_pad for m in mods} | {m.n_pad for m in mods}
        if len(dims) != 1:
            return False
        hp = dims.pop()
        # Weights are single-buffered (Buffered(1)) but must still fit in the
        # generation-aware VMEM budget alongside streaming tiles.
        return len(mods) * hp * hp * 2 <= _FUSABLE_WEIGHT_BUDGET

    def _forward_impl(self, x, epoch, iteration, device_id):
        if self._fusable:
            B, S, H = x.shape
            y2d = fused_chain_forward(x.reshape(B * S, H), self._wts, self._bs,
                                      self._gelu_flags, self._out_features)
            return y2d.reshape(B, S, self._out_features)
        # Unfused path: intermediate layers emit bf16 (halves inter-layer HBM
        # traffic); final layer stays f32 for the external consumer.
        n = len(self.modules_list)
        for idx, module in enumerate(self.modules_list):
            dt = jnp.float32 if idx == n - 1 else jnp.bfloat16
            x = module(x, epoch, iteration, device_id, out_dtype=dt)
        return x

    def __call__(self, x, epoch, iteration, device_id):
        return self._jit_forward(x, epoch, iteration, device_id)


# ---------------------------------------------------------------------------
# reference mirroring the kernels' numerics (bf16 MXU inputs, f32 accumulate)
# ---------------------------------------------------------------------------
def reference_forward(x, modules):
    B, S, H = x.shape
    h = x.reshape(B * S, H)
    for m in modules:
        y = jnp.dot(h.astype(jnp.bfloat16), m.weight.T.astype(jnp.bfloat16),
                    preferred_element_type=jnp.float32) + m.bias
        if m.use_gelu:
            y = jax.nn.gelu(y)
        h = y
    return h.reshape(B, S, -1)


# ---------------------------------------------------------------------------
if __name__ == "__main__":
    key = jax.random.PRNGKey(0)
    k_in, k0, k1, k2 = jax.random.split(key, 4)

    batch, seq, hidden = 2, 8, 32
    x = jax.random.normal(k_in, (batch, seq, hidden), jnp.float32)

    layers = (
        QuantLinearFP(k0, hidden, hidden, use_gelu=True),
        QuantLinearFP(k1, hidden, hidden, use_gelu=True),
        QuantLinearFP(k2, hidden, hidden, use_gelu=False),
    )

    epoch, iteration, device_id = 0, 0, 0

    # fused path: whole 3-layer chain in ONE pallas_call
    model = CustomSequential(*layers)
    out = jax.block_until_ready(model(x, epoch, iteration, device_id))

    # unfused fallback path: one tiled pallas_call per layer
    model_unfused = CustomSequential(*layers, fuse=False)
    out_unfused = jax.block_until_ready(
        model_unfused(x, epoch, iteration, device_id))

    ref = reference_forward(x, layers)

    assert out.shape == (batch, seq, hidden)
    assert jnp.allclose(out, ref, atol=2e-3, rtol=2e-3), \
        float(jnp.max(jnp.abs(out - ref)))
    assert jnp.allclose(out_unfused, ref, atol=2e-3, rtol=2e-3), \
        float(jnp.max(jnp.abs(out_unfused - ref)))

    print("KERNEL_OK")
</pallas_src>

<mosaic_0001>
module attributes {stable_mosaic.version = 11 : i64} {
  func.func @_fused_chain_kernel(%arg0: i32, %arg1: memref<8x128xf32, #tpu.memory_space<vmem>>, %arg2: memref<3x128x128xbf16, #tpu.memory_space<vmem>>, %arg3: memref<3x1x128xf32, #tpu.memory_space<vmem>>, %arg4: memref<8x128xf32, #tpu.memory_space<vmem>>) attributes {dimension_semantics = [#tpu.dimension_semantics<parallel>], iteration_bounds = array<i64: 2>, scalar_prefetch = 0 : i64, scratch_operands = 0 : i64, tpu.core_type = #tpu.core_type<tc>, window_params = [{transform_indices = @transform_0, window_bounds = array<i64: 8, 128>}, {pipeline_mode = #tpu.pipeline_mode<synchronous>, transform_indices = @transform_1, window_bounds = array<i64: 3, 128, 128>}, {pipeline_mode = #tpu.pipeline_mode<synchronous>, transform_indices = @transform_2, window_bounds = array<i64: 3, 1, 128>}, {transform_indices = @transform_3, window_bounds = array<i64: 8, 128>}]} {
    %c0 = arith.constant 0 : index
    %c0_0 = arith.constant 0 : index
    %0 = vector.load %arg1[%c0, %c0_0] : memref<8x128xf32, #tpu.memory_space<vmem>>, vector<8x128xf32>
    %1 = arith.truncf %0 : vector<8x128xf32> to vector<8x128xbf16>
    %c0_1 = arith.constant 0 : index
    %c0_2 = arith.constant 0 : index
    %c0_3 = arith.constant 0 : index
    %2 = vector.load %arg2[%c0_1, %c0_2, %c0_3] : memref<3x128x128xbf16, #tpu.memory_space<vmem>>, vector<1x128x128xbf16>
    %3 = vector.shape_cast %2 : vector<1x128x128xbf16> to vector<128x128xbf16>
    %cst = arith.constant dense<0.000000e+00> : vector<8x128xf32>
    %4 = tpu.matmul %1, %3, %cst {dimension_numbers = #tpu.dot_dimension_numbers<[1], [0], [0], [1], [0, 0, 1, 1], [], []>} : vector<8x128xbf16>, vector<128x128xbf16>, vector<8x128xf32> -> vector<8x128xf32>
    %c0_4 = arith.constant 0 : index
    %c0_5 = arith.constant 0 : index
    %c0_6 = arith.constant 0 : index
    %5 = vector.load %arg3[%c0_4, %c0_5, %c0_6] : memref<3x1x128xf32, #tpu.memory_space<vmem>>, vector<1x1x128xf32>
    %6 = vector.shape_cast %5 : vector<1x1x128xf32> to vector<1x128xf32>
    %7 = vector.broadcast %6 : vector<1x128xf32> to vector<8x128xf32>
    %8 = arith.addf %4, %7 : vector<8x128xf32>
    %9 = arith.mulf %8, %8 : vector<8x128xf32>
    %10 = arith.mulf %8, %9 : vector<8x128xf32>
    %cst_7 = arith.constant 4.471500e-02 : f32
    %11 = vector.broadcast %cst_7 : f32 to vector<8x128xf32>
    %12 = arith.mulf %11, %10 : vector<8x128xf32>
    %13 = arith.addf %8, %12 : vector<8x128xf32>
    %cst_8 = arith.constant 0.797884583 : f32
    %14 = vector.broadcast %cst_8 : f32 to vector<8x128xf32>
    %15 = arith.mulf %14, %13 : vector<8x128xf32>
    %16 = math.tanh %15 : vector<8x128xf32>
    %cst_9 = arith.constant 1.000000e+00 : f32
    %17 = vector.broadcast %cst_9 : f32 to vector<8x128xf32>
    %18 = arith.addf %17, %16 : vector<8x128xf32>
    %cst_10 = arith.constant 5.000000e-01 : f32
    %19 = vector.broadcast %cst_10 : f32 to vector<8x128xf32>
    %20 = arith.mulf %19, %18 : vector<8x128xf32>
    %21 = arith.mulf %8, %20 : vector<8x128xf32>
    %22 = arith.truncf %21 : vector<8x128xf32> to vector<8x128xbf16>
    %c1 = arith.constant 1 : index
    %c0_11 = arith.constant 0 : index
    %c0_12 = arith.constant 0 : index
    %23 = vector.load %arg2[%c1, %c0_11, %c0_12] : memref<3x128x128xbf16, #tpu.memory_space<vmem>>, vector<1x128x128xbf16>
    %24 = vector.shape_cast %23 : vector<1x128x128xbf16> to vector<128x128xbf16>
    %cst_13 = arith.constant dense<0.000000e+00> : vector<8x128xf32>
    %25 = tpu.matmul %22, %24, %cst_13 {dimension_numbers = #tpu.dot_dimension_numbers<[1], [0], [0], [1], [0, 0, 1, 1], [], []>} : vector<8x128xbf16>, vector<128x128xbf16>, vector<8x128xf32> -> vector<8x128xf32>
    %c1_14 = arith.constant 1 : index
    %c0_15 = arith.constant 0 : index
    %c0_16 = arith.constant 0 : index
    %26 = vector.load %arg3[%c1_14, %c0_15, %c0_16] : memref<3x1x128xf32, #tpu.memory_space<vmem>>, vector<1x1x128xf32>
    %27 = vector.shape_cast %26 : vector<1x1x128xf32> to vector<1x128xf32>
    %28 = vector.broadcast %27 : vector<1x128xf32> to vector<8x128xf32>
    %29 = arith.addf %25, %28 : vector<8x128xf32>
    %30 = arith.mulf %29, %29 : vector<8x128xf32>
    %31 = arith.mulf %29, %30 : vector<8x128xf32>
    %cst_17 = arith.constant 4.471500e-02 : f32
    %32 = vector.broadcast %cst_17 : f32 to vector<8x128xf32>
    %33 = arith.mulf %32, %31 : vector<8x128xf32>
    %34 = arith.addf %29, %33 : vector<8x128xf32>
    %cst_18 = arith.constant 0.797884583 : f32
    %35 = vector.broadcast %cst_18 : f32 to vector<8x128xf32>
    %36 = arith.mulf %35, %34 : vector<8x128xf32>
    %37 = math.tanh %36 : vector<8x128xf32>
    %cst_19 = arith.constant 1.000000e+00 : f32
    %38 = vector.broadcast %cst_19 : f32 to vector<8x128xf32>
    %39 = arith.addf %38, %37 : vector<8x128xf32>
    %cst_20 = arith.constant 5.000000e-01 : f32
    %40 = vector.broadcast %cst_20 : f32 to vector<8x128xf32>
    %41 = arith.mulf %40, %39 : vector<8x128xf32>
    %42 = arith.mulf %29, %41 : vector<8x128xf32>
    %43 = arith.truncf %42 : vector<8x128xf32> to vector<8x128xbf16>
    %c2 = arith.constant 2 : index
    %c0_21 = arith.constant 0 : index
    %c0_22 = arith.constant 0 : index
    %44 = vector.load %arg2[%c2, %c0_21, %c0_22] : memref<3x128x128xbf16, #tpu.memory_space<vmem>>, vector<1x128x128xbf16>
    %45 = vector.shape_cast %44 : vector<1x128x128xbf16> to vector<128x128xbf16>
    %cst_23 = arith.constant dense<0.000000e+00> : vector<8x128xf32>
    %46 = tpu.matmul %43, %45, %cst_23 {dimension_numbers = #tpu.dot_dimension_numbers<[1], [0], [0], [1], [0, 0, 1, 1], [], []>} : vector<8x128xbf16>, vector<128x128xbf16>, vector<8x128xf32> -> vector<8x128xf32>
    %c2_24 = arith.constant 2 : index
    %c0_25 = arith.constant 0 : index
    %c0_26 = arith.constant 0 : index
    %47 = vector.load %arg3[%c2_24, %c0_25, %c0_26] : memref<3x1x128xf32, #tpu.memory_space<vmem>>, vector<1x1x128xf32>
    %48 = vector.shape_cast %47 : vector<1x1x128xf32> to vector<1x128xf32>
    %49 = vector.broadcast %48 : vector<1x128xf32> to vector<8x128xf32>
    %50 = arith.addf %46, %49 : vector<8x128xf32>
    %c0_27 = arith.constant 0 : index
    %c0_28 = arith.constant 0 : index
    %51 = vector.load %arg4[%c0_27, %c0_28] : memref<8x128xf32, #tpu.memory_space<vmem>>, vector<8x128xf32>
    tpu.vector_store %arg4[%c0_27, %c0_28], %50 {strides = array<i32>} : memref<8x128xf32, #tpu.memory_space<vmem>>, vector<8x128xf32>,
    return
  }
  func.func @transform_0(%arg0: i32) -> (i32, i32) {
    %c0_i32 = arith.constant 0 : i32
    %c0_i32_0 = arith.constant 0 : i32
    return %arg0, %c0_i32 : i32, i32
  }
  func.func @transform_1(%arg0: i32) -> (i32, i32, i32) {
    %c0_i32 = arith.constant 0 : i32
    %c0_i32_0 = arith.constant 0 : i32
    %c0_i32_1 = arith.constant 0 : i32
    %c0_i32_2 = arith.constant 0 : i32
    return %c0_i32, %c0_i32_0, %c0_i32_1 : i32, i32, i32
  }
  func.func @transform_2(%arg0: i32) -> (i32, i32, i32) {
    %c0_i32 = arith.constant 0 : i32
    %c0_i32_0 = arith.constant 0 : i32
    %c0_i32_1 = arith.constant 0 : i32
    %c0_i32_2 = arith.constant 0 : i32
    return %c0_i32, %c0_i32_0, %c0_i32_1 : i32, i32, i32
  }
  func.func @transform_3(%arg0: i32) -> (i32, i32) {
    %c0_i32 = arith.constant 0 : i32
    %c0_i32_0 = arith.constant 0 : i32
    return %arg0, %c0_i32 : i32, i32
  }
}

</mosaic_0001>

<bundles_post_ra>
// kernel: _forward_impl.1
= control target key start
LH: loop header
LB: loop body
LE: loop exit
PB: predicated region body
PF: predicated region fallthrough
CT: control target
= control target key end

     0   :  { %8 = vsyncpa [#allocation3], 0  ;;  %s848_s12 = smov 0   ;;  %s933_s0 = inlined_call_operand.vmem [shape: f32[16,128], index: 0, kind: input, shape index: {}]   ;;  %s934_s1 = inlined_call_operand.hbm [shape: bf16[3,128,128], index: 1, kind: input, shape index: {}]   ;;  %s935_s2 = inlined_call_operand.vmem [shape: f32[3,1,128], index: 2, kind: input, shape index: {}]   ;;  %s936_s3 = inlined_call_operand.vmem [shape: f32[16,128], index: 3, kind: output, shape index: {}]  }
   0x1 LB: > { %s854_s13 = sadd.s32 4294967295, %s821_s12   ;;  %p609_p0 = scmp.ge.s32.totalorder %s821_s12, 1  ;;  %s821_s12 = sphi %s848_s12, %s14_s12  }
   0x2   : > { %p113_p1 = scmp.lt.s32.totalorder %s821_s12, 3  ;;  %s823_s14 = smov [#allocation2]  }
   0x3   : > { %s125_s15 = sshll.u32 %s823_s14, 4  ;;  %p742_p3 = scmp.eq.s32.totalorder %s854_s13, 0  ;;  %s126_s15 = int_to_ptr.vmem [resolvable:$true] %s125_s15 }
   0x4   : > { %p858_p2 = pnand %p609_p0, %p113_p1  ;;  %s796_s17 = scalar_lea.vmem %s126_s15, 3072 }
   0x5   : > { %p797_p7 = scmp.ne.s32.totalorder %s126_s15, %s796_s17  ;;  %p804_p10 = scmp.lt.s32.totalorder %s126_s15, %s126_s15 }
   0x6   : > { %p738_p4 = pneg %p858_p2  ;;  %p805_p11 = scmp.lt.s32.totalorder %s796_s17, %s796_s17 }
   0x8   : > { %p739_p5 = pnand %p742_p3, %p738_p4  ;;  %p806_p12 = por %p805_p11, %p804_p10 }
   0xa   : > { %p787_p6 = pneg %p739_p5 }
   0xc   : > { %p799_p8 = pnand %p797_p7, %p787_p6 }
   0xe   : > { %p800_p9 = pneg %p799_p8 }
  0x10   : > { %p807_p13 = pnand %p806_p12, %p800_p9 }
  0x12   : > { %810 = shalt.err (!%p807_p13)
}
  0x13   : > { %s824_s18 = smov 64   ;;  %s825_s19 = smov 4  }
  0x14   : > { %741 = dma.hbm_to_vmem [thread:$0]  (!%p739_p5), %s934_s1, 3072, %s126_s15, [#allocation3], %s824_s18, %s824_s18, %s825_s19  }
  0x15   : > { %151 = sbr.rel (%p858_p2) target bundleno = 714 (0x2ca), region = 32 }
  0x1a   : > { %816 = dma.done.wait (%p742_p3), [#allocation3], 3072  }
  0x1b   : > { %818 = vsyncadd (%p742_p3), [#allocation3], 4294964224  ;;  %v826_v0 = vmov 0.0   ;;  %vm827_vm0 = vmmov 0   ;;  %v757_v1 = vld [vmem:[#allocation2 + $0x38] sm:$0xff]   ;;  %v758_v2 = vld [vmem:[#allocation2 + $0x30] sm:$0xff]  }
  0x1c   : > { %674 = vmatprep.subr.bf16.mxu0 %v826_v0  ;;  %690 = vmatprep.mubr.msk.bf16.mxu0 %vm827_vm0, %v826_v0  ;;  %p173_p0 = scmp.lt.s32.totalorder %s854_s13, 1  ;;  %v759_v3 = vld [vmem:[#allocation2 + $0x28] sm:$0xff]   ;;  %v760_v4 = vld [vmem:[#allocation2 + $0x20] sm:$0xff]   ;;  %v761_v5 = vld [vmem:[#allocation2 + $0x18] sm:$0xff]  }
  0x1d   : > { %694 = vmatprep.subr.bf16.mxu1 %v826_v0  ;;  %710 = vmatprep.mubr.msk.bf16.mxu1 %vm827_vm0, %v826_v0  ;;  %v762_v6 = vld [vmem:[#allocation2 + $0x10] sm:$0xff]   ;;  %v763_v7 = vld [vmem:[#allocation2 + $0x8] sm:$0xff]   ;;  %v764_v8 = vld [vmem:[#allocation2] sm:$0xff]  }
  0x1e   : > { %675 = vmatpush3.bf16.msra.mxu0 %v757_v1  ;;  %s939_s13 = smov (!%p173_p0, %s854_s13), 1  ;;  %v765_v11 = vld [vmem:[#allocation2 + $0x78] sm:$0xff]   ;;  %v766_v12 = vld [vmem:[#allocation2 + $0x70] sm:$0xff]   ;;  %v767_v13 = vld [vmem:[#allocation2 + $0x68] sm:$0xff]  }
  0x1f   : > { %676 = vmatprep.subr.bf16.mxu0 %v826_v0  ;;  %s614_s22 = sshll.u32 %s939_s13, 3  ;;  %695 = vmatpush3.bf16.msra.mxu1 %v765_v11  ;;  %v768_v14 = vld [vmem:[#allocation2 + $0x60] sm:$0xff]   ;;  %v769_v15 = vld [vmem:[#allocation2 + $0x58] sm:$0xff]   ;;  %v770_v16 = vld [vmem:[#allocation2 + $0x50] sm:$0xff]  }
  0x20   : > { %s176_s25 = scalar_lea.vmem %s933_s0, %s614_s22  ;;  %696 = vmatprep.subr.bf16.mxu1 %v826_v0  ;;  %v771_v17 = vld [vmem:[#allocation2 + $0x48] sm:$0xff]   ;;  %v772_v18 = vld [vmem:[#allocation2 + $0x40] sm:$0xff]   ;;  %v773_v35 = vld [vmem:[#allocation2 + $0xb8] sm:$0xff]   ;;  %s180_s7 = scalar_lea.vmem %s936_s3, %s614_s22 }
  0x21   : > { %v182_v9 = vld [vmem:[%s176_s25] sm:$0xff]  ;;  %v774_v36 = vld [vmem:[#allocation2 + $0xb0] sm:$0xff]   ;;  %v775_v37 = vld [vmem:[#allocation2 + $0xa8] sm:$0xff]  }
  0x22   : > { %677 = vmatpush3.bf16.msra.mxu0 %v758_v2  ;;  %v183_v10 = vpack.c.bf16 %v182_v9, %v182_v9  ;;  %v616_v19 = vld [vmem:[%s935_s2] ss:$0 sm:$0xff]  ;;  %v777_v39 = vld [vmem:[#allocation2 + $0x98] sm:$0xff]   ;;  %v778_v40 = vld [vmem:[#allocation2 + $0x90] sm:$0xff]  }
  0x23   : > { %678 = vmatprep.subr.bf16.mxu0 %v826_v0  ;;  %697 = vmatpush3.bf16.msra.mxu1 %v766_v12  ;;  %v776_v38 = vld [vmem:[#allocation2 + $0xa0] sm:$0xff]   ;;  %v779_v41 = vld [vmem:[#allocation2 + $0x88] sm:$0xff]  }
  0x24   : > { %698 = vmatprep.subr.bf16.mxu1 %v826_v0  ;;  %v780_v42 = vld [vmem:[#allocation2 + $0x80] sm:$0xff]  }
  0x25   : > { %v626_v43 = vld [vmem:[%s935_s2 + $0x1] ss:$0 sm:$0xff]  ;;  %v636_v59 = vld [vmem:[%s935_s2 + $0x2] ss:$0 sm:$0xff] }
  0x26   : > { %679 = vmatpush3.bf16.msra.mxu0 %v759_v3 }
  0x27   : > { %680 = vmatprep.subr.bf16.mxu0 %v826_v0  ;;  %699 = vmatpush3.bf16.msra.mxu1 %v767_v13 }
  0x28   : > { %700 = vmatprep.subr.bf16.mxu1 %v826_v0 }
  0x2a   : > { %681 = vmatpush3.bf16.msra.mxu0 %v760_v4 }
  0x2b   : > { %682 = vmatprep.subr.bf16.mxu0 %v826_v0  ;;  %701 = vmatpush3.bf16.msra.mxu1 %v768_v14 }
  0x2c   : > { %702 = vmatprep.subr.bf16.mxu1 %v826_v0 }
  0x2e   : > { %683 = vmatpush3.bf16.msra.mxu0 %v761_v5 }
  0x2f   : > { %684 = vmatprep.subr.bf16.mxu0 %v826_v0  ;;  %703 = vmatpush3.bf16.msra.mxu1 %v769_v15 }
  0x30   : > { %704 = vmatprep.subr.bf16.mxu1 %v826_v0 }
  0x32   : > { %685 = vmatpush3.bf16.msra.mxu0 %v762_v6 }
  0x33   : > { %686 = vmatprep.subr.bf16.mxu0 %v826_v0  ;;  %705 = vmatpush3.bf16.msra.mxu1 %v770_v16 }
  0x34   : > { %706 = vmatprep.subr.bf16.mxu1 %v826_v0 }
  0x36   : > { %687 = vmatpush3.bf16.msra.mxu0 %v763_v7 }
  0x37   : > { %688 = vmatprep.subr.bf16.mxu0 %v826_v0  ;;  %707 = vmatpush3.bf16.msra.mxu1 %v771_v17 }
  0x38   : > { %708 = vmatprep.subr.bf16.mxu1 %v826_v0 }
  0x3a   : > { %689 = vmatpush3.bf16.msra.mxu0 %v764_v8 }
  0x3b   : > { %714 = vmatprep.subr.bf16.mxu0 %v826_v0  ;;  %709 = vmatpush3.bf16.msra.mxu1 %v772_v18 }
  0x3d   : > { %691 = vmatmul.mubr.bf16.vlgmr.msra.gmra.mxu0 %v183_v10 }
  0x3e   : > { %730 = vmatprep.mubr.msk.bf16.mxu0 %vm827_vm0, %v826_v0  ;;  %715 = vmatpush3.bf16.msra.mxu0 %v773_v35 }
  0x3f   : > { %716 = vmatprep.subr.bf16.mxu0 %v826_v0 }
  0x42   : > { %717 = vmatpush3.bf16.msra.mxu0 %v774_v36 }
  0x43   : > { %718 = vmatprep.subr.bf16.mxu0 %v826_v0 }
  0x46   : > { %719 = vmatpush3.bf16.msra.mxu0 %v775_v37 }
  0x47   : > { %720 = vmatprep.subr.bf16.mxu0 %v826_v0 }
  0x4a   : > { %721 = vmatpush3.bf16.msra.mxu0 %v776_v38 }
  0x4b   : > { %722 = vmatprep.subr.bf16.mxu0 %v826_v0 }
  0x4e   : > { %723 = vmatpush3.bf16.msra.mxu0 %v777_v39 }
  0x4f   : > { %724 = vmatprep.subr.bf16.mxu0 %v826_v0 }
  0x52   : > { %725 = vmatpush3.bf16.msra.mxu0 %v778_v40 }
  0x53   : > { %726 = vmatprep.subr.bf16.mxu0 %v826_v0 }
  0x56   : > { %727 = vmatpush3.bf16.msra.mxu0 %v779_v41 }
  0x57   : > { %728 = vmatprep.subr.bf16.mxu0 %v826_v0 }
  0x5a   : > { %729 = vmatpush3.bf16.msra.mxu0 %v780_v42 }
  0xfd   : > { %v289_v20 = vpop.f32.mrf.mxu0 }
  0xfe   : > { %v290_v21 = vadd.f32 %v616_v19, %v289_v20 }
  0xff   : > { %v692_v22 = vpop.f32.mrf.mxu0 }
 0x100   : > { %v295_v23 = vmul.f32 %v290_v21, %v290_v21 }
 0x101   : > { %v292_v24 = vpop.f32.mrf.mxu0 }
 0x102   : > { %v296_v25 = vmul.f32 %v295_v23, %v290_v21 }
 0x103   : > { %v693_v26 = vpop.f32.mrf.mxu0 }
 0x104   : > { %v297_v27 = vmul.f32 0.044715, %v296_v25 }
 0x106   : > { %v298_v28 = vadd.f32 %v297_v27, %v290_v21 }
 0x108   : > { %v299_v29 = vmul.f32 0.7978846, %v298_v28 }
 0x10a   : > { %781 = vtanh.f32 %v299_v29 }
 0x117   : > { %v782_v30 = vpop.eup %781 }
 0x118   : > { %v301_v31 = vadd.f32 1.0, %v782_v30 }
 0x11a   : > { %v302_v32 = vmul.f32 0.5, %v301_v31 }
 0x11c   : > { %v303_v33 = vmul.f32 %v302_v32, %v290_v21 }
 0x11e   : > { %v304_v34 = vpack.c.bf16 %v303_v33, %v303_v33 }
 0x120   : > { %711 = vmatmul.mubr.bf16.vlgmr.msra.gmra.mxu1 %v304_v34 }
 0x1e0   : > { %v412_v44 = vpop.f32.mrf.mxu1 }
 0x1e1   : > { %v413_v45 = vadd.f32 %v626_v43, %v412_v44 }
 0x1e2   : > { %v712_v46 = vpop.f32.mrf.mxu1 }
 0x1e3   : > { %v418_v47 = vmul.f32 %v413_v45, %v413_v45 }
 0x1e4   : > { %v415_v48 = vpop.f32.mrf.mxu1 }
 0x1e5   : > { %v419_v49 = vmul.f32 %v418_v47, %v413_v45 }
 0x1e6   : > { %v713_v50 = vpop.f32.mrf.mxu1 }
 0x1e7   : > { %v420_v51 = vmul.f32 0.044715, %v419_v49 }
 0x1e9   : > { %v421_v52 = vadd.f32 %v420_v51, %v413_v45 }
 0x1eb   : > { %v422_v53 = vmul.f32 0.7978846, %v421_v52 }
 0x1ed   : > { %783 = vtanh.f32 %v422_v53 }
 0x1fa   : > { %v784_v54 = vpop.eup %783 }
 0x1fb   : > { %v424_v55 = vadd.f32 1.0, %v784_v54 }
 0x1fd   : > { %v425_v56 = vmul.f32 0.5, %v424_v55 }
 0x1ff   : > { %v426_v57 = vmul.f32 %v425_v56, %v413_v45 }
 0x201   : > { %v427_v58 = vpack.c.bf16 %v426_v57, %v426_v57 }
 0x203   : > { %731 = vmatmul.mubr.bf16.vlgmr.msra.gmra.mxu0 %v427_v58 }
 0x2c3   : > { %v535_v60 = vpop.f32.mrf.mxu0 }
 0x2c4   : > { %v536_v61 = vadd.f32 %v636_v59, %v535_v60 }
 0x2c5   : > { %v732_v62 = vpop.f32.mrf.mxu0 }
 0x2c6   : > { %541 = vst [vmem:[%s180_s7] sm:$0xff] %v536_v61 }
 0x2c7   : > { %v538_v63 = vpop.f32.mrf.mxu0 }
 0x2c9   : > { %v733_v0 = vpop.f32.mrf.mxu0 }
 0x2ca PF: > { %s14_s12 = sadd.s32 1, %s821_s12  }
 0x2cb   : > { %p11_p1 = scmp.ge.s32.totalorder %s14_s12, 4  }
 0x2cd   :  { %13 = sbr.rel (!%p11_p1) target bundleno = 1 (0x1), region = 71 }
 0x2d2   :  { %561 = vsyncpa [#allocation3], 1 }
 0x2d3   :  { %563 = vsyncpa [#allocation3 + $0x1], 1 }

</bundles_post_ra>
